<compile_context>
chip_gen: v6e
topology: v6e:2x2x1
jax: 0.10.0
libtpu: 0.0.40
codegen_flags: <defaults>
</compile_context>

<pallas_src>
import jax
import jax.numpy as jnp
from jax.experimental import pallas as pl
from jax.experimental.pallas import tpu as pltpu


def _gconv_matmul_kernel(a_ref, x_ref, o_ref, acc_ref):
    """One (V, TK) x (TK, TN) MXU tile of OUT2 = A @ X2, accumulated over K."""
    @pl.when(pl.program_id(1) == 0)
    def _init():
        acc_ref[...] = jnp.zeros_like(acc_ref)

    acc_ref[...] += jnp.dot(a_ref[...], x_ref[...],
                            preferred_element_type=jnp.float32)

    @pl.when(pl.program_id(1) == pl.num_programs(1) - 1)
    def _finalize():
        o_ref[...] = acc_ref[...].astype(o_ref.dtype)


def _choose_tn(nd, tn_target):
    # Lane (last-dim) tile: must be a multiple of 128, or equal the full extent.
    assert tn_target % 128 == 0
    return nd if nd <= tn_target else tn_target


def _choose_tk(w, tk_target):
    # Contraction tile: must exactly divide W (a partial K block would fold
    # out-of-bounds garbage into the accumulator) and be a multiple of 128
    # (lane rule for A's last block dim), unless it equals the full extent W.
    if w <= tk_target:
        return w
    for cand in (tk_target, 1024, 512, 256, 128):
        if cand <= tk_target and cand % 128 == 0 and w % cand == 0:
            return cand
    return w  # no aligned divisor: keep the whole K axis resident (correct, more VMEM)


def gconv(x, A, *, tn_target=1024, tk_target=512):
    """out[n, v, d] = sum_w A[v, w] * x[n, w, d].

    x: (N, W, D), A: (V, W) -> (N, V, D).
    """
    N, W, D = x.shape
    V, W2 = A.shape
    assert W == W2, "A second dim must match x node dim"
    ND = N * D
    itemsize = x.dtype.itemsize

    # Lane-dense flatten: X2[w, n*D + d] = x[n, w, d].
    x2 = jnp.transpose(x, (1, 0, 2)).reshape(W, ND)

    TN = _choose_tn(ND, tn_target)
    TK = _choose_tk(W, tk_target)

    # VMEM budget: double-buffered A / X2 / OUT2 tiles + f32 accumulator.  Keep
    # it comfortably below v7x's 64 MiB per TensorCore (safe on v5e/v6e's
    # 128 MiB as well); shrink the lane tile if a very large V would blow it.
    def _budget_bytes(tn, tk):
        return 2 * (V * tk + tk * tn + V * tn) * itemsize + V * tn * 4

    while _budget_bytes(TN, TK) > (40 << 20) and TN % 256 == 0:
        TN //= 2

    # (8,128) rule: last block dims are multiples of 128 or the full extent.
    assert TN == ND or TN % 128 == 0
    assert TK == W or TK % 128 == 0

    vmem_limit = int(min(max(_budget_bytes(TN, TK) + (8 << 20), 32 << 20), 64 << 20))

    grid = (pl.cdiv(ND, TN), pl.cdiv(W, TK))

    cost = pl.CostEstimate(
        flops=2 * N * V * W * D,
        transcendentals=0,
        bytes_accessed=itemsize * (N * W * D + N * V * D + V * W),
    )

    out2 = pl.pallas_call(
        _gconv_matmul_kernel,
        out_shape=jax.ShapeDtypeStruct((V, ND), x.dtype),
        grid_spec=pltpu.PrefetchScalarGridSpec(
            num_scalar_prefetch=0,
            grid=grid,
            in_specs=[
                # A tile: all V rows, TK columns of the contraction axis.
                pl.BlockSpec((V, TK), lambda j, k: (0, k)),
                # X2 tile: TK contraction rows, TN lane-dense output columns.
                pl.BlockSpec((TK, TN), lambda j, k: (k, j)),
            ],
            # Output block index independent of k -> stays resident across the
            # reduction axis (accumulator pattern, finalized via pl.when).
            out_specs=pl.BlockSpec((V, TN), lambda j, k: (0, j)),
            scratch_shapes=[pltpu.VMEM((V, TN), jnp.float32)],
        ),
        compiler_params=pltpu.CompilerParams(
            dimension_semantics=("parallel", "arbitrary"),
            vmem_limit_bytes=vmem_limit,
        ),
        cost_estimate=cost,
    )(A, x2)

    # Back to the PyTorch layout: (V, N*D) -> (N, V, D), contiguous.
    return jnp.transpose(out2.reshape(V, N, D), (1, 0, 2))


def gconv_ref(x, A):
    # Pure-JAX reference matching torch.einsum('vw,nwd->nvd', A, x).
    return jnp.einsum("vw,nwd->nvd", A, x, precision=jax.lax.Precision.HIGHEST)


if __name__ == "__main__":
    key = jax.random.PRNGKey(0)
    k1, k2, k3, k4 = jax.random.split(key, 4)

    # Test 1: original small shapes (single grid step, full-extent blocks).
    N, V, W, D = 2, 16, 16, 32
    x = jax.random.normal(k1, (N, W, D), dtype=jnp.float32)
    A = jax.random.normal(k2, (V, W), dtype=jnp.float32)
    out = jax.block_until_ready(gconv(x, A))
    ref = gconv_ref(x, A)
    assert out.shape == (N, V, D)
    assert jnp.allclose(out, ref, atol=1e-4, rtol=1e-4), "mismatch vs reference (test 1)"

    # Test 2: small tile targets so the multi-step paths are exercised
    # (3 lane tiles incl. a partial last block, 3 contraction/accumulator steps).
    Nb, Vb, Wb, Db = 5, 24, 384, 128
    xb = jax.random.normal(k3, (Nb, Wb, Db), dtype=jnp.float32)
    Ab = jax.random.normal(k4, (Vb, Wb), dtype=jnp.float32)
    outb = jax.block_until_ready(gconv(xb, Ab, tn_target=256, tk_target=128))
    refb = gconv_ref(xb, Ab)
    assert outb.shape == (Nb, Vb, Db)
    rel_err = jnp.max(jnp.abs(outb - refb)) / (jnp.max(jnp.abs(refb)) + 1e-6)
    assert rel_err < 2e-3, f"mismatch vs reference (test 2), rel_err={rel_err}"

    print("KERNEL_OK")
</pallas_src>

<mosaic_0001>
module attributes {stable_mosaic.version = 11 : i64} {
  func.func @_gconv_matmul_kernel(%arg0: i32, %arg1: i32, %arg2: memref<16x16xf32, #tpu.memory_space<vmem>>, %arg3: memref<16x64xf32, #tpu.memory_space<vmem>>, %arg4: memref<16x64xf32, #tpu.memory_space<vmem>>, %arg5: memref<16x64xf32, #tpu.memory_space<vmem>>) attributes {dimension_semantics = [#tpu.dimension_semantics<parallel>, #tpu.dimension_semantics<arbitrary>], iteration_bounds = array<i64: 1, 1>, scalar_prefetch = 0 : i64, scratch_operands = 1 : i64, tpu.core_type = #tpu.core_type<tc>, window_params = [{transform_indices = @transform_0, window_bounds = array<i64: 16, 16>}, {transform_indices = @transform_1, window_bounds = array<i64: 16, 64>}, {transform_indices = @transform_2, window_bounds = array<i64: 16, 64>}]} {
    %c0_i32 = arith.constant 0 : i32
    %0 = arith.cmpi eq, %arg1, %c0_i32 : i32
    %1 = arith.extui %0 : i1 to i32
    %c0_i32_0 = arith.constant 0 : i32
    %2 = arith.cmpi ne, %1, %c0_i32_0 : i32
    scf.if %2 {
      %cst_10 = arith.constant 0.000000e+00 : f32
      %12 = vector.broadcast %cst_10 : f32 to vector<16x64xf32>
      %c0_11 = arith.constant 0 : index
      %c0_12 = arith.constant 0 : index
      %13 = vector.load %arg5[%c0_11, %c0_12] : memref<16x64xf32, #tpu.memory_space<vmem>>, vector<16x64xf32>
      tpu.vector_store %arg5[%c0_11, %c0_12], %12 {strides = array<i32>} : memref<16x64xf32, #tpu.memory_space<vmem>>, vector<16x64xf32>,
    } else {
    }
    %c0 = arith.constant 0 : index
    %c0_1 = arith.constant 0 : index
    %3 = vector.load %arg5[%c0, %c0_1] : memref<16x64xf32, #tpu.memory_space<vmem>>, vector<16x64xf32>
    %c0_2 = arith.constant 0 : index
    %c0_3 = arith.constant 0 : index
    %4 = vector.load %arg2[%c0_2, %c0_3] : memref<16x16xf32, #tpu.memory_space<vmem>>, vector<16x16xf32>
    %c0_4 = arith.constant 0 : index
    %c0_5 = arith.constant 0 : index
    %5 = vector.load %arg3[%c0_4, %c0_5] : memref<16x64xf32, #tpu.memory_space<vmem>>, vector<16x64xf32>
    %cst = arith.constant dense<0.000000e+00> : vector<16x64xf32>
    %6 = tpu.matmul %4, %5, %cst {dimension_numbers = #tpu.dot_dimension_numbers<[1], [0], [0], [1], [0, 0, 1, 1], [], []>} : vector<16x16xf32>, vector<16x64xf32>, vector<16x64xf32> -> vector<16x64xf32>
    %7 = arith.addf %3, %6 : vector<16x64xf32>
    %c0_6 = arith.constant 0 : index
    %c0_7 = arith.constant 0 : index
    %8 = vector.load %arg5[%c0_6, %c0_7] : memref<16x64xf32, #tpu.memory_space<vmem>>, vector<16x64xf32>
    tpu.vector_store %arg5[%c0_6, %c0_7], %7 {strides = array<i32>} : memref<16x64xf32, #tpu.memory_space<vmem>>, vector<16x64xf32>,
    %c0_i32_8 = arith.constant 0 : i32
    %9 = arith.cmpi eq, %arg1, %c0_i32_8 : i32
    %10 = arith.extui %9 : i1 to i32
    %c0_i32_9 = arith.constant 0 : i32
    %11 = arith.cmpi ne, %10, %c0_i32_9 : i32
    scf.if %11 {
      %c0_10 = arith.constant 0 : index
      %c0_11 = arith.constant 0 : index
      %12 = vector.load %arg5[%c0_10, %c0_11] : memref<16x64xf32, #tpu.memory_space<vmem>>, vector<16x64xf32>
      %c0_12 = arith.constant 0 : index
      %c0_13 = arith.constant 0 : index
      %13 = vector.load %arg4[%c0_12, %c0_13] : memref<16x64xf32, #tpu.memory_space<vmem>>, vector<16x64xf32>
      tpu.vector_store %arg4[%c0_12, %c0_13], %12 {strides = array<i32>} : memref<16x64xf32, #tpu.memory_space<vmem>>, vector<16x64xf32>,
    } else {
    }
    return
  }
  func.func @transform_0(%arg0: i32, %arg1: i32) -> (i32, i32) {
    %c0_i32 = arith.constant 0 : i32
    %c0_i32_0 = arith.constant 0 : i32
    return %c0_i32, %arg1 : i32, i32
  }
  func.func @transform_1(%arg0: i32, %arg1: i32) -> (i32, i32) {
    %c0_i32 = arith.constant 0 : i32
    return %arg1, %arg0 : i32, i32
  }
  func.func @transform_2(%arg0: i32, %arg1: i32) -> (i32, i32) {
    %c0_i32 = arith.constant 0 : i32
    %c0_i32_0 = arith.constant 0 : i32
    return %c0_i32, %arg0 : i32, i32
  }
}

</mosaic_0001>

<bundles_post_ra>
// kernel: tpu_custom_call.1
= control target key start
LH: loop header
LB: loop body
LE: loop exit
PB: predicated region body
PF: predicated region fallthrough
CT: control target
= control target key end

     0   :  { %7 = vsyncpa [#allocation4], 0  ;;  %s295_s0 = inlined_call_operand.hbm [shape: f32[16,16], index: 0, kind: input, shape index: {}]   ;;  %s296_s1 = inlined_call_operand.hbm [shape: f32[16,64], index: 1, kind: input, shape index: {}]   ;;  %s297_s2 = inlined_call_operand.hbm [shape: f32[16,64], index: 2, kind: output, shape index: {}]  }
   0x1   :  { %8 = vsyncpa [#allocation7], 0 }
   0x2   :  { %9 = vsyncpa [#allocation5], 0  ;;  %s250_s9 = smov [#allocation3]  }
   0x3   :  { %s15_s10 = sshll.u32 %s250_s9, 4  ;;  %s16_s10 = int_to_ptr.vmem [resolvable:$true] %s15_s10 }
   0x4   :  { %s192_s11 = scalar_lea.vmem %s16_s10, 256  ;;  %p197_p1 = scmp.lt.s32.totalorder %s16_s10, %s16_s10 }
   0x5   :  { %p193_p0 = scmp.ne.s32.totalorder %s16_s10, %s192_s11  ;;  %p198_p2 = scmp.lt.s32.totalorder %s192_s11, %s192_s11 }
   0x7   :  { %p199_p3 = por %p198_p2, %p197_p1 }
   0x9   :  { %p200_p4 = pnand %p199_p3, %p193_p0 }
   0xb   :  { %203 = shalt.err (!%p200_p4)
}
   0xc   :  { %s251_s12 = smov 128   ;;  %s252_s13 = smov 8  }
   0xd   :  { %21 = dma.hbm_to_vmem [thread:$0]  %s295_s0, 256, %s16_s10, [#allocation4], %s251_s12, %s251_s12, %s252_s13  }
   0xe   :  { %s253_s16 = smov [#allocation6]  }
   0xf   :  { %s27_s17 = sshll.u32 %s253_s16, 4  ;;  %s28_s17 = int_to_ptr.vmem [resolvable:$true] %s27_s17 }
  0x10   :  { %s212_s18 = scalar_lea.vmem %s28_s17, 256  ;;  %p217_p6 = scmp.lt.s32.totalorder %s28_s17, %s28_s17 }
  0x11   :  { %p213_p5 = scmp.ne.s32.totalorder %s28_s17, %s212_s18  ;;  %p218_p7 = scmp.lt.s32.totalorder %s212_s18, %s212_s18 }
  0x13   :  { %p219_p8 = por %p218_p7, %p217_p6 }
  0x15   :  { %p220_p9 = pnand %p219_p8, %p213_p5 }
  0x17   :  { %223 = shalt.err (!%p220_p9)
}
  0x18   :  { %33 = dma.hbm_to_vmem [thread:$0]  %s296_s1, 256, %s28_s17, [#allocation7], %s251_s12, %s251_s12, %s252_s13  }
  0x19   :  { %244 = dma.done.wait [#allocation4], 256  }
  0x1a   :  { %245 = vsyncadd [#allocation4], 4294967040 }
  0x1b   :  { %246 = dma.done.wait [#allocation7], 256  }
  0x1c   :  { %247 = vsyncadd [#allocation7], 4294967040  ;;  %vm44_vm0 = vcmask 523264   ;;  %v254_v0 = vmov 0.0   ;;  %vm53_vm1 = vcmask 130048   ;;  %v52_v1 = vld [vmem:[#allocation6 + $0x8] sm:$0xff] }
  0x1d   :  { %46 = vst.msk [vmem:[#allocation2 + $0x8] sm:$0xff] %vm44_vm0, %v254_v0  ;;  %45 = vst.msk [vmem:[#allocation2] sm:$0xff] %vm44_vm0, %v254_v0  ;;  %v51_v2 = vld [vmem:[#allocation6] sm:$0xff]  ;;  %v49_v3 = vld [vmem:[#allocation3] sm:$0xff]  ;;  %171 = vmatprep.subr.mxu0 %v52_v1  ;;  %s255_s0 = smov [#allocation8]  }
  0x1e   :  { %175 = vmatprep.mubr.msk.f32.mxu0 %vm53_vm1, %v49_v3  ;;  %172 = vmatpush3.msra.mxu0 %v52_v1  ;;  %v50_v4 = vld [vmem:[#allocation3 + $0x8] sm:$0xff]  ;;  %s152_s1 = sshll.u32 %s255_s0, 4  ;;  %s153_s1 = int_to_ptr.vmem [resolvable:$true] %s152_s1 }
  0x1f   :  { %173 = vmatprep.subr.mxu0 %v51_v2  ;;  %s224_s21 = scalar_lea.vmem %s153_s1, 256  ;;  %p229_p11 = scmp.lt.s32.totalorder %s153_s1, %s153_s1 }
  0x20   :  { %174 = vmatpush3.msra.mxu0 %v51_v2  ;;  %p225_p10 = scmp.ne.s32.totalorder %s153_s1, %s224_s21  ;;  %p230_p12 = scmp.lt.s32.totalorder %s224_s21, %s224_s21 }
  0x21   :  { %176 = vmatmul.mubr.msk.f32.vlgmr.msra.gmra.mxu0 %vm53_vm1, %v50_v4 }
  0x22   :  { %p231_p13 = por %p230_p12, %p229_p11 }
  0x24   :  { %v48_v5 = vld [vmem:[#allocation2 + $0x8] sm:$0xff]  ;;  %v47_v7 = vld [vmem:[#allocation2] sm:$0xff]  ;;  %p232_p0 = pnand %p231_p13, %p225_p10 }
  0xe1   :  { %v177_v6 = vpop.f32.mrf.mxu0 }
  0xe2   :  { %v136_v8 = vadd.f32 %v177_v6, %v48_v5 }
  0xe3   :  { %v126_v9 = vpop.f32.mrf.mxu0 }
  0xe4   :  { %139 = vst.msk [vmem:[#allocation2 + $0x8] sm:$0xff] %vm44_vm0, %v136_v8  ;;  %v135_v10 = vadd.f32 %v126_v9, %v47_v7 }
  0xe6   :  { %138 = vst.msk [vmem:[#allocation2] sm:$0xff] %vm44_vm0, %v135_v10 }
  0xeb   :  { %v144_v11 = vld [vmem:[#allocation2 + $0x8] sm:$0xff] }
  0xec   :  { %146 = vst.msk [vmem:[#allocation8 + $0x8] sm:$0xff] %vm44_vm0, %v144_v11 }
  0xed   :  { %v143_v12 = vld [vmem:[#allocation2] sm:$0xff] }
  0xee   :  { %145 = vst.msk [vmem:[#allocation8] sm:$0xff] %vm44_vm0, %v143_v12 }
  0xef   :  { %235 = shalt.err (!%p232_p0)
}
  0xf0   :  { %158 = dma.vmem_to_hbm [thread:$0]  %s153_s1, 256, %s297_s2, [#allocation5], %s251_s12, %s251_s12, %s252_s13  }
  0xf1   :  { %248 = dma.done.wait [#allocation5], 256  }
  0xf2   :  { %249 = vsyncadd [#allocation5], 4294967040 }
  0xf3   :  { %162 = vsyncpa [#allocation4], 1 }
  0xf4   :  { %163 = vsyncpa [#allocation7], 1 }
  0xf5   :  { %164 = vsyncpa [#allocation5], 1 }

</bundles_post_ra>
